<compile_context>
chip_gen: v7x
topology: tpu7x:2x2x1
jax: 0.10.0
libtpu: 0.0.40
codegen_flags: <defaults>
</compile_context>

<pallas_src>
import math
import functools
import jax
import jax.numpy as jnp
from jax.experimental import pallas as pl
from jax.experimental.pallas import tpu as pltpu

D = 128  # feature width fixed by the module


def _mlp_kernel(x_ref, w1_ref, b1_ref, w2_ref, b2_ref, o_ref):
    # x tile: (TM, 128) in compute dtype (bf16). Weights/biases are
    # VMEM-resident across the grid (constant index_map).
    x = x_ref[...]
    h = jnp.dot(x, w1_ref[...], preferred_element_type=jnp.float32) + b1_ref[...]
    h = h.astype(w2_ref.dtype)  # back to bf16 for the second MXU pass
    y = jnp.dot(h, w2_ref[...], preferred_element_type=jnp.float32) + b2_ref[...]
    o_ref[...] = y.astype(o_ref.dtype)


def prepare_params(w1, b1, w2, b2, compute_dtype=jnp.bfloat16):
    """Hoisted once per model: PyTorch (out,in) weights -> (in,out), cast to
    the matmul compute dtype; biases kept f32 as (1, 128) VMEM tiles."""
    w1_t = jnp.asarray(w1, jnp.float32).T.astype(compute_dtype)
    w2_t = jnp.asarray(w2, jnp.float32).T.astype(compute_dtype)
    b1_2d = jnp.asarray(b1, jnp.float32).reshape(1, D)
    b2_2d = jnp.asarray(b2, jnp.float32).reshape(1, D)
    return w1_t, b1_2d, w2_t, b2_2d


def _round_up(a, b):
    return ((a + b - 1) // b) * b


@functools.partial(jax.jit, static_argnames=("tm",))
def my_module_forward(x, params, tm=1024):
    """x: (M, 128). params: output of prepare_params. Returns (y,) with
    y.dtype == x.dtype, matching the PyTorch module's forward."""
    w1_t, b1_2d, w2_t, b2_2d = params
    M, d = x.shape
    assert d == D, f"feature dim must be {D}, got {d}"

    compute_dtype = w1_t.dtype
    out_dtype = x.dtype

    # Tile the batch dim. TM is a multiple of 8; pad M up to a multiple of TM
    # so every block is (8,128)-aligned and output stores are unmasked.
    TM = min(tm, _round_up(M, 8))
    M_pad = _round_up(M, TM)

    x_in = x.astype(compute_dtype)
    if M_pad != M:
        x_in = jnp.pad(x_in, ((0, M_pad - M), (0, 0)))

    y = pl.pallas_call(
        _mlp_kernel,
        out_shape=jax.ShapeDtypeStruct((M_pad, D), out_dtype),
        grid_spec=pltpu.PrefetchScalarGridSpec(
            num_scalar_prefetch=0,
            grid=(M_pad // TM,),
            in_specs=[
                pl.BlockSpec((TM, D), lambda i: (i, 0)),   # x tile (streamed)
                pl.BlockSpec((D, D), lambda i: (0, 0)),    # W1^T (resident)
                pl.BlockSpec((1, D), lambda i: (0, 0)),    # b1  (resident)
                pl.BlockSpec((D, D), lambda i: (0, 0)),    # W2^T (resident)
                pl.BlockSpec((1, D), lambda i: (0, 0)),    # b2  (resident)
            ],
            out_specs=pl.BlockSpec((TM, D), lambda i: (i, 0)),
        ),
        compiler_params=pltpu.CompilerParams(
            dimension_semantics=("parallel",),
        ),
    )(x_in, w1_t, b1_2d, w2_t, b2_2d)

    if M_pad != M:
        y = y[:M]
    return (y,)


def _init_linear_params(key, in_features, out_features):
    # Deterministic init mimicking nn.Linear's default:
    # U(-1/sqrt(in), 1/sqrt(in)) for both weight and bias.
    kw, kb = jax.random.split(key)
    bound = 1.0 / math.sqrt(in_features)
    w = jax.random.uniform(kw, (out_features, in_features), jnp.float32,
                           minval=-bound, maxval=bound)
    b = jax.random.uniform(kb, (out_features,), jnp.float32,
                           minval=-bound, maxval=bound)
    return w, b


if __name__ == "__main__":
    key = jax.random.PRNGKey(0)
    kx, k1, k2 = jax.random.split(key, 3)

    # Small example: M=40 with tm=16 exercises multi-step tiling (grid=3) and
    # tail padding (40 -> 48). Production default is tm=1024.
    M = 40
    x = jax.random.normal(kx, (M, D), jnp.float32)
    w1, b1 = _init_linear_params(k1, D, D)
    w2, b2 = _init_linear_params(k2, D, D)

    params = prepare_params(w1, b1, w2, b2)   # hoisted transpose/cast (once)

    (y,) = my_module_forward(x, params, tm=16)
    y = jax.block_until_ready(y)

    # Sanity check against plain-JAX f32 reference. bf16 matmul operands with
    # f32 accumulation -> expect ~1e-2 relative agreement.
    y_ref = (x @ w1.T + b1) @ w2.T + b2
    assert y.shape == y_ref.shape and y.dtype == x.dtype
    assert jnp.allclose(y, y_ref, atol=2e-2, rtol=2e-2), "mismatch vs reference"

    print("KERNEL_OK")
</pallas_src>

<mosaic_0001>
module attributes {stable_mosaic.version = 11 : i64} {
  func.func @_mlp_kernel(%arg0: i32, %arg1: memref<16x128xbf16, #tpu.memory_space<vmem>>, %arg2: memref<128x128xbf16, #tpu.memory_space<vmem>>, %arg3: memref<1x128xf32, #tpu.memory_space<vmem>>, %arg4: memref<128x128xbf16, #tpu.memory_space<vmem>>, %arg5: memref<1x128xf32, #tpu.memory_space<vmem>>, %arg6: memref<16x128xf32, #tpu.memory_space<vmem>>) attributes {dimension_semantics = [#tpu.dimension_semantics<parallel>], iteration_bounds = array<i64: 3>, scalar_prefetch = 0 : i64, scratch_operands = 0 : i64, tpu.core_type = #tpu.core_type<tc>, window_params = [{transform_indices = @transform_0, window_bounds = array<i64: 16, 128>}, {pipeline_mode = #tpu.pipeline_mode<synchronous>, transform_indices = @transform_1, window_bounds = array<i64: 128, 128>}, {pipeline_mode = #tpu.pipeline_mode<synchronous>, transform_indices = @transform_2, window_bounds = array<i64: 1, 128>}, {pipeline_mode = #tpu.pipeline_mode<synchronous>, transform_indices = @transform_3, window_bounds = array<i64: 128, 128>}, {pipeline_mode = #tpu.pipeline_mode<synchronous>, transform_indices = @transform_4, window_bounds = array<i64: 1, 128>}, {transform_indices = @transform_5, window_bounds = array<i64: 16, 128>}]} {
    %c0 = arith.constant 0 : index
    %c0_0 = arith.constant 0 : index
    %0 = vector.load %arg1[%c0, %c0_0] : memref<16x128xbf16, #tpu.memory_space<vmem>>, vector<16x128xbf16>
    %c0_1 = arith.constant 0 : index
    %c0_2 = arith.constant 0 : index
    %1 = vector.load %arg2[%c0_1, %c0_2] : memref<128x128xbf16, #tpu.memory_space<vmem>>, vector<128x128xbf16>
    %cst = arith.constant dense<0.000000e+00> : vector<16x128xf32>
    %2 = tpu.matmul %0, %1, %cst {dimension_numbers = #tpu.dot_dimension_numbers<[1], [0], [0], [1], [0, 0, 1, 1], [], []>} : vector<16x128xbf16>, vector<128x128xbf16>, vector<16x128xf32> -> vector<16x128xf32>
    %c0_3 = arith.constant 0 : index
    %c0_4 = arith.constant 0 : index
    %3 = vector.load %arg3[%c0_3, %c0_4] : memref<1x128xf32, #tpu.memory_space<vmem>>, vector<1x128xf32>
    %4 = vector.broadcast %3 : vector<1x128xf32> to vector<16x128xf32>
    %5 = arith.addf %2, %4 : vector<16x128xf32>
    %6 = arith.truncf %5 : vector<16x128xf32> to vector<16x128xbf16>
    %c0_5 = arith.constant 0 : index
    %c0_6 = arith.constant 0 : index
    %7 = vector.load %arg4[%c0_5, %c0_6] : memref<128x128xbf16, #tpu.memory_space<vmem>>, vector<128x128xbf16>
    %cst_7 = arith.constant dense<0.000000e+00> : vector<16x128xf32>
    %8 = tpu.matmul %6, %7, %cst_7 {dimension_numbers = #tpu.dot_dimension_numbers<[1], [0], [0], [1], [0, 0, 1, 1], [], []>} : vector<16x128xbf16>, vector<128x128xbf16>, vector<16x128xf32> -> vector<16x128xf32>
    %c0_8 = arith.constant 0 : index
    %c0_9 = arith.constant 0 : index
    %9 = vector.load %arg5[%c0_8, %c0_9] : memref<1x128xf32, #tpu.memory_space<vmem>>, vector<1x128xf32>
    %10 = vector.broadcast %9 : vector<1x128xf32> to vector<16x128xf32>
    %11 = arith.addf %8, %10 : vector<16x128xf32>
    %c0_10 = arith.constant 0 : index
    %c0_11 = arith.constant 0 : index
    %12 = vector.load %arg6[%c0_10, %c0_11] : memref<16x128xf32, #tpu.memory_space<vmem>>, vector<16x128xf32>
    tpu.vector_store %arg6[%c0_10, %c0_11], %11 {strides = array<i32>} : memref<16x128xf32, #tpu.memory_space<vmem>>, vector<16x128xf32>,
    return
  }
  func.func @transform_0(%arg0: i32) -> (i32, i32) {
    %c0_i32 = arith.constant 0 : i32
    %c0_i32_0 = arith.constant 0 : i32
    return %arg0, %c0_i32 : i32, i32
  }
  func.func @transform_1(%arg0: i32) -> (i32, i32) {
    %c0_i32 = arith.constant 0 : i32
    %c0_i32_0 = arith.constant 0 : i32
    %c0_i32_1 = arith.constant 0 : i32
    return %c0_i32, %c0_i32_0 : i32, i32
  }
  func.func @transform_2(%arg0: i32) -> (i32, i32) {
    %c0_i32 = arith.constant 0 : i32
    %c0_i32_0 = arith.constant 0 : i32
    %c0_i32_1 = arith.constant 0 : i32
    return %c0_i32, %c0_i32_0 : i32, i32
  }
  func.func @transform_3(%arg0: i32) -> (i32, i32) {
    %c0_i32 = arith.constant 0 : i32
    %c0_i32_0 = arith.constant 0 : i32
    %c0_i32_1 = arith.constant 0 : i32
    return %c0_i32, %c0_i32_0 : i32, i32
  }
  func.func @transform_4(%arg0: i32) -> (i32, i32) {
    %c0_i32 = arith.constant 0 : i32
    %c0_i32_0 = arith.constant 0 : i32
    %c0_i32_1 = arith.constant 0 : i32
    return %c0_i32, %c0_i32_0 : i32, i32
  }
  func.func @transform_5(%arg0: i32) -> (i32, i32) {
    %c0_i32 = arith.constant 0 : i32
    %c0_i32_0 = arith.constant 0 : i32
    return %arg0, %c0_i32 : i32, i32
  }
}

</mosaic_0001>

<bundles_post_ra>
// kernel: my_module_forward.1
= control target key start
LH: loop header
LB: loop body
LE: loop exit
PB: predicated region body
PF: predicated region fallthrough
CT: control target
= control target key end

     0   :  { %10 = vsyncpa [#allocation3], 0  ;;  %s752_s18 = smov 0   ;;  %s848_s0 = inlined_call_operand.vmem [shape: bf16[48,128], index: 0, kind: input, shape index: {}]   ;;  %s849_s1 = inlined_call_operand.vmem [shape: bf16[128,128], index: 1, kind: input, shape index: {}]   ;;  %s850_s2 = inlined_call_operand.vmem [shape: f32[1,128], index: 2, kind: input, shape index: {}]   ;;  %s851_s3 = inlined_call_operand.hbm [shape: bf16[128,128], index: 3, kind: input, shape index: {}]   ;;  %s852_s4 = inlined_call_operand.vmem [shape: f32[1,128], index: 4, kind: input, shape index: {}]   ;;  %s853_s5 = inlined_call_operand.vmem [shape: f32[48,128], index: 5, kind: output, shape index: {}]  }
   0x1 LB: > { %s547_s19 = sadd.s32 4294967295, %s715_s18   ;;  %p549_p0 = scmp.ge.s32.totalorder %s715_s18, 1  ;;  %s715_s18 = sphi %s752_s18, %s16_s18  }
   0x2   : > { %p157_p1 = scmp.lt.s32.totalorder %s715_s18, 4  ;;  %s717_s20 = smov [#allocation2]  }
   0x3   : > { %s175_s21 = sshll.u32 %s717_s20, 4  ;;  %p766_p3 = scmp.eq.s32.totalorder %s547_s19, 0  ;;  %s176_s21 = int_to_ptr.vmem [resolvable:$true] %s175_s21 }
   0x4   : > { %p760_p2 = pnand %p549_p0, %p157_p1  ;;  %s677_s27 = scalar_lea.hbm %s851_s3, 1024 }
   0x5   : > { %s858_s23 = scalar_select %p766_p3, 1, 0 }
   0x6   : > { %s857_s22 = scalar_select %p760_p2, 1, 0 }
   0x7   : > { %p641_p4 = pneg %p760_p2  ;;  %p678_p6 = scmp.ne.s32.totalorder %s851_s3, %s677_s27 }
   0x8   : > { %p684_p10 = scmp.lt.u32.totalorder %s677_s27, %s851_s3 }
   0x9   : > { %p774_p5 = pnand %p766_p3, %p641_p4 }
   0xb   : > { %p679_p7 = pneg %p774_p5 }
   0xd   : > { %p680_p8 = pnand %p679_p7, %p678_p6 }
   0xf   : > { %p681_p9 = pneg %p680_p8 }
  0x11   : > { %p686_p11 = pnand %p684_p10, %p681_p9 }
  0x13   : > { %689 = shalt.err (!%p686_p11)
}
  0x14   : > { %s690_s7 = scalar_lea.vmem %s176_s21, 1024  ;;  %p698_p1 = scmp.lt.s32.totalorder %s176_s21, %s176_s21 }
  0x15   : > { %p691_p12 = scmp.ne.s32.totalorder %s176_s21, %s690_s7  ;;  %p699_p4 = scmp.lt.s32.totalorder %s690_s7, %s690_s7 }
  0x17   : > { %p693_p13 = pnand %p691_p12, %p679_p7  ;;  %p700_p3 = por %p699_p4, %p698_p1 }
  0x19   : > { %p694_p0 = pneg %p693_p13 }
  0x1b   : > { %p701_p2 = pnand %p700_p3, %p694_p0 }
  0x1d   : > { %704 = shalt.err (!%p701_p2)
}
  0x1e   : > { %s718_s8 = smov 64   ;;  %s719_s9 = smov 4  }
  0x1f   : > { %644 = dma.hbm_to_vmem [thread:$0]  (!%p774_p5), %s851_s3, 1024, %s176_s21, [#allocation3], %s718_s8, %s718_s8, %s719_s9  }
  0x20   : > { %p860_p6 = scmp.ne.s32.totalorder %s857_s22, 0 }
  0x21   : > { %p861_p8 = scmp.ne.s32.totalorder (!%p860_p6), %s858_s23, 0 }
  0x22   : > { %203 = sbr.rel (%p860_p6) target bundleno = 511 (0x1ff), region = 40 }
  0x29   : > { %710 = dma.done.wait (%p861_p8), [#allocation3], 1024  }
  0x2a   : > { %712 = vsyncadd (%p861_p8), [#allocation3], 4294966272  ;;  %s554_s12 = sshll.u32 %s547_s19, 1  ;;  %v720_v0 = vmov 0.0   ;;  %vm721_vm0 = vmmov 0   ;;  %v660_v1 = vld [vmem:[%s849_s1] sm:$0xff]  }
  0x2b   : > { %597 = vmatprep.subr.bf16.mxu0 %v720_v0  ;;  %613 = vmatprep.mubr.msk.bf16.mxu0 %vm721_vm0, %v720_v0  ;;  %p232_p2 = scmp.lt.s32.totalorder %s554_s12, 5  ;;  %v661_v2 = vld [vmem:[%s849_s1 + $0x8] sm:$0xff]   ;;  %v662_v3 = vld [vmem:[%s849_s1 + $0x10] sm:$0xff]   ;;  %v669_v4 = vld [vmem:[#allocation2] sm:$0xff]  }
  0x2c   : > { %617 = vmatprep.subr.bf16.mxu1 %v720_v0  ;;  %633 = vmatprep.mubr.msk.bf16.mxu1 %vm721_vm0, %v720_v0  ;;  %v663_v5 = vld [vmem:[%s849_s1 + $0x18] sm:$0xff]   ;;  %v670_v6 = vld [vmem:[#allocation2 + $0x8] sm:$0xff]   ;;  %v664_v7 = vld [vmem:[%s849_s1 + $0x20] sm:$0xff]  }
  0x2d   : > { %s863_s12 = smov (!%p232_p2, %s554_s12), 5  ;;  %598 = vmatpush3.bf16.msra.mxu0 %v660_v1  ;;  %618 = vmatpush3.bf16.msra.mxu1 %v669_v4  ;;  %v671_v8 = vld [vmem:[#allocation2 + $0x10] sm:$0xff]   ;;  %v665_v9 = vld [vmem:[%s849_s1 + $0x28] sm:$0xff]   ;;  %v672_v10 = vld [vmem:[#allocation2 + $0x18] sm:$0xff]  }
  0x2e   : > { %599 = vmatprep.subr.bf16.mxu0 %v720_v0  ;;  %s555_s17 = sshll.u32 %s863_s12, 2  ;;  %619 = vmatprep.subr.bf16.mxu1 %v720_v0  ;;  %v666_v11 = vld [vmem:[%s849_s1 + $0x30] sm:$0xff]   ;;  %v673_v12 = vld [vmem:[#allocation2 + $0x20] sm:$0xff]   ;;  %v667_v13 = vld [vmem:[%s849_s1 + $0x38] sm:$0xff]   ;;  %s557_s11 = sshll.u32 %s863_s12, 3 }
  0x2f   : > { %s817_s23 = scalar_lea.vmem %s848_s0, %s555_s17  ;;  %v674_v14 = vld [vmem:[#allocation2 + $0x28] sm:$0xff]   ;;  %v675_v16 = vld [vmem:[#allocation2 + $0x30] sm:$0xff]   ;;  %v676_v17 = vld [vmem:[#allocation2 + $0x38] sm:$0xff]   ;;  %s241_s17 = scalar_lea.vmem %s853_s5, %s557_s11 }
  0x30   : > { %v668_v15 = vld [vmem:[%s817_s23] sm:$0xff]  }
  0x31   : > { %600 = vmatpush3.bf16.msra.mxu0 %v661_v2  ;;  %620 = vmatpush3.bf16.msra.mxu1 %v670_v6  ;;  %v558_v18 = vld [vmem:[%s850_s2] ss:$0 sm:$0xff] }
  0x32   : > { %601 = vmatprep.subr.bf16.mxu0 %v720_v0  ;;  %621 = vmatprep.subr.bf16.mxu1 %v720_v0  ;;  %v568_v26 = vld [vmem:[%s852_s4] ss:$0 sm:$0xff] }
  0x35   : > { %602 = vmatpush3.bf16.msra.mxu0 %v662_v3  ;;  %622 = vmatpush3.bf16.msra.mxu1 %v671_v8 }
  0x36   : > { %603 = vmatprep.subr.bf16.mxu0 %v720_v0  ;;  %623 = vmatprep.subr.bf16.mxu1 %v720_v0 }
  0x39   : > { %604 = vmatpush3.bf16.msra.mxu0 %v663_v5  ;;  %624 = vmatpush3.bf16.msra.mxu1 %v672_v10 }
  0x3a   : > { %605 = vmatprep.subr.bf16.mxu0 %v720_v0  ;;  %625 = vmatprep.subr.bf16.mxu1 %v720_v0 }
  0x3d   : > { %606 = vmatpush3.bf16.msra.mxu0 %v664_v7  ;;  %626 = vmatpush3.bf16.msra.mxu1 %v673_v12 }
  0x3e   : > { %607 = vmatprep.subr.bf16.mxu0 %v720_v0  ;;  %627 = vmatprep.subr.bf16.mxu1 %v720_v0 }
  0x41   : > { %608 = vmatpush3.bf16.msra.mxu0 %v665_v9  ;;  %628 = vmatpush3.bf16.msra.mxu1 %v674_v14 }
  0x42   : > { %609 = vmatprep.subr.bf16.mxu0 %v720_v0  ;;  %629 = vmatprep.subr.bf16.mxu1 %v720_v0 }
  0x45   : > { %610 = vmatpush3.bf16.msra.mxu0 %v666_v11  ;;  %630 = vmatpush3.bf16.msra.mxu1 %v675_v16 }
  0x46   : > { %611 = vmatprep.subr.bf16.mxu0 %v720_v0  ;;  %631 = vmatprep.subr.bf16.mxu1 %v720_v0 }
  0x49   : > { %612 = vmatpush3.bf16.msra.mxu0 %v667_v13  ;;  %632 = vmatpush3.bf16.msra.mxu1 %v676_v17 }
  0x4c   : > { %614 = vmatmul.mubr.bf16.vlgmr.msra.gmra.mrb[0].mxu0 %v668_v15 }
 0x11f   : > { %v357_v19 = vpop.f32.mrb[0].mxu0 }
 0x120   : > { %v615_v20 = vpop.f32.mrb[1].mxu0  ;;  %v358_v22 = vadd.f32 %v558_v18, %v357_v19 }
 0x121   : > { %v360_v21 = vpop.f32.mrb[2].mxu0 }
 0x122   : > { %v361_v23 = vadd.f32 %v558_v18, %v360_v21  ;;  %v616_v24 = vpop.f32.mrb[3].mxu0 }
 0x124   : > { %v364_v25 = vpack.c.bf16 %v361_v23, %v358_v22 }
 0x126   : > { %634 = vmatmul.mubr.bf16.vlgmr.msra.gmra.mrb[0].mxu1 %v364_v25 }
 0x1f9   : > { %v470_v27 = vpop.f32.mrb[0].mxu1 }
 0x1fa   : > { %v471_v28 = vadd.f32 %v568_v26, %v470_v27  ;;  %v635_v29 = vpop.f32.mrb[1].mxu1 }
 0x1fb   : > { %v473_v30 = vpop.f32.mrb[2].mxu1 }
 0x1fc   : > { %477 = vst [vmem:[%s241_s17] sm:$0xff] %v471_v28  ;;  %v474_v31 = vadd.f32 %v568_v26, %v473_v30  ;;  %v636_v32 = vpop.f32.mrb[3].mxu1 }
 0x1fe   : > { %478 = vst [vmem:[%s241_s17 + $0x8] sm:$0xff] %v474_v31 }
 0x1ff PF: > { %s16_s18 = sadd.s32 1, %s715_s18  }
 0x200   : > { %p13_p3 = scmp.ge.s32.totalorder %s16_s18, 5  }
 0x202   :  { %15 = sbr.rel (!%p13_p3) target bundleno = 1 (0x1), region = 75 }
 0x209   :  { %501 = vsyncpa [#allocation3], 1 }
 0x20a   :  { %503 = vsyncpa [#allocation3 + $0x1], 1 }

</bundles_post_ra>
